<compile_context>
chip_gen: v7x
topology: tpu7x:2x2x1
jax: 0.10.0
libtpu: 0.0.40
codegen_flags: <defaults>
</compile_context>

<pallas_src>
import jax
import jax.numpy as jnp
from jax.experimental import pallas as pl
from jax.experimental.pallas import tpu as pltpu


# ------------------------------- kernels -----------------------------------


def _gcn_fused_kernel(x_ref, adj_ref, w_ref, b_ref, o_ref):
    """Whole-graph kernel: one grid step = a tile of Bt batch elements."""
    Bt, Np, D_in = x_ref.shape
    Dp = w_ref.shape[1]

    # support = x @ W as ONE flattened matmul (M = Bt*Np keeps the MXU full for small N).
    x2d = x_ref[...].reshape(Bt * Np, D_in)
    support = jnp.dot(x2d, w_ref[...], preferred_element_type=jnp.float32)
    support = support.reshape(Bt, Np, Dp)

    adj = adj_ref[...]
    narrow_hops = adj.dtype != jnp.float32  # bf16 on BOTH MXU operands when adj is bf16

    t = support.astype(adj.dtype) if narrow_hops else support
    t = jnp.einsum("bij,bjk->bik", adj, t, preferred_element_type=jnp.float32)
    t = t.astype(adj.dtype) if narrow_hops else t
    t = jnp.einsum("bij,bjk->bik", adj, t, preferred_element_type=jnp.float32)
    t = t.astype(adj.dtype) if narrow_hops else t
    t = jnp.einsum("bij,bjk->bik", adj, t, preferred_element_type=jnp.float32)

    o_ref[...] = (t + b_ref[...]).astype(o_ref.dtype)


def _support_rows_kernel(x_ref, w_ref, o_ref):
    """(row_tile, D_in) @ (D_in, Dp) for one (batch, row-tile) grid point."""
    o_ref[0] = jnp.dot(
        x_ref[0], w_ref[...], preferred_element_type=jnp.float32
    ).astype(o_ref.dtype)


def _hop_rows_kernel(adj_ref, t_ref, b_ref, o_ref):
    """(row_tile, Np) @ (Np, Dp) + bias; t stays resident per batch element."""
    acc = jnp.dot(adj_ref[0], t_ref[0], preferred_element_type=jnp.float32)
    o_ref[0] = (acc + b_ref[...]).astype(o_ref.dtype)


# ------------------------------- helpers -----------------------------------


def _vmem_capacity_bytes():
    """Physical per-core VMEM; conservative fallback (v7x = 64 MiB) if query fails."""
    try:
        info = pltpu.get_tpu_info()
        for attr in ("vmem_capacity_bytes", "vmem_size_bytes", "vmem_bytes"):
            v = getattr(info, attr, None)
            if v:
                return int(v)
    except Exception:
        pass
    return 64 * 1024 * 1024


def _round_up(n, m):
    return ((n + m - 1) // m) * m


def _largest_divisor_leq(n, cap):
    cap = max(1, min(n, int(cap)))
    for d in range(cap, 0, -1):
        if n % d == 0:
            return d
    return 1


# ----------------------------- path: fused ----------------------------------


def _gcn_fused(x, adj, w_p, b_p, out_dtype, bt_fit, vmem_limit):
    B, Np, D_in = x.shape
    Dp = w_p.shape[1]

    # >=2 grid steps so both v7x TensorCores get work; Bt divides B (no batch-pad copy).
    bt_cap = min(int(bt_fit), max(1, (B + 1) // 2))
    Bt = _largest_divisor_leq(B, bt_cap)
    grid = (B // Bt,)

    flops = 2 * B * Np * Dp * (D_in + 3 * Np)
    bytes_accessed = (
        B * Np * Np * adj.dtype.itemsize
        + B * Np * D_in * x.dtype.itemsize
        + D_in * Dp * w_p.dtype.itemsize
        + B * Np * Dp * out_dtype.itemsize
    )

    return pl.pallas_call(
        _gcn_fused_kernel,
        out_shape=jax.ShapeDtypeStruct((B, Np, Dp), out_dtype),
        grid_spec=pltpu.PrefetchScalarGridSpec(
            num_scalar_prefetch=0,
            grid=grid,
            in_specs=[
                pl.BlockSpec((Bt, Np, D_in), lambda i: (i, 0, 0)),  # x tile
                pl.BlockSpec((Bt, Np, Np), lambda i: (i, 0, 0)),    # adj tile
                pl.BlockSpec((D_in, Dp), lambda i: (0, 0)),         # W (resident)
                pl.BlockSpec((1, Dp), lambda i: (0, 0)),            # bias (resident)
            ],
            out_specs=pl.BlockSpec((Bt, Np, Dp), lambda i: (i, 0, 0)),
        ),
        compiler_params=pltpu.CompilerParams(
            dimension_semantics=("parallel",),
            vmem_limit_bytes=vmem_limit,
        ),
        cost_estimate=pl.CostEstimate(
            flops=int(flops), transcendentals=0, bytes_accessed=int(bytes_accessed)
        ),
    )(x, adj, w_p, b_p)


# --------------------------- path: row-tiled (large N) ----------------------


def _gcn_row_tiled(x, adj, w_p, b_p, out_dtype, budget, vmem_limit):
    B, Np, D_in = x.shape
    Dp = w_p.shape[1]

    # Intermediates kept in adj.dtype when it is sub-f32 (bf16 on both MXU operands).
    hop_dtype = adj.dtype if adj.dtype != jnp.float32 else jnp.float32

    # Row tile: largest 128-multiple whose streamed adj slab + resident t fits the budget.
    row_tile = 128
    for rt in (1024, 512, 256, 128):
        need = (
            2 * rt * Np * adj.dtype.itemsize  # adj row slab (double-buffered)
            + 2 * Np * Dp * 4                 # resident support/t (double-buffered)
            + 2 * rt * Dp * 4                 # output rows
        )
        if Np % rt == 0 and need <= budget:
            row_tile = rt
            break
    # TODO(synk): add a Dp (column) tiling axis for graphs where even the resident
    # (Np, Dp) slab exceeds the VMEM budget.

    zero_bias = jnp.zeros((1, Dp), jnp.float32)
    grid = (B, Np // row_tile)
    params = pltpu.CompilerParams(
        dimension_semantics=("parallel", "parallel"),
        vmem_limit_bytes=vmem_limit,
    )

    # 1) support = x @ W (row-tiled, W resident).
    support = pl.pallas_call(
        _support_rows_kernel,
        out_shape=jax.ShapeDtypeStruct((B, Np, Dp), hop_dtype),
        grid_spec=pltpu.PrefetchScalarGridSpec(
            num_scalar_prefetch=0,
            grid=grid,
            in_specs=[
                pl.BlockSpec((1, row_tile, D_in), lambda b, r: (b, r, 0)),
                pl.BlockSpec((D_in, Dp), lambda b, r: (0, 0)),
            ],
            out_specs=pl.BlockSpec((1, row_tile, Dp), lambda b, r: (b, r, 0)),
        ),
        compiler_params=params,
    )(x, w_p)

    # 2) three propagation hops: t <- adj @ t, adj streamed row-tile by row-tile.
    def hop(t, bias_arr, o_dtype):
        return pl.pallas_call(
            _hop_rows_kernel,
            out_shape=jax.ShapeDtypeStruct((B, Np, Dp), o_dtype),
            grid_spec=pltpu.PrefetchScalarGridSpec(
                num_scalar_prefetch=0,
                grid=grid,
                in_specs=[
                    pl.BlockSpec((1, row_tile, Np), lambda b, r: (b, r, 0)),
                    pl.BlockSpec((1, Np, Dp), lambda b, r: (b, 0, 0)),
                    pl.BlockSpec((1, Dp), lambda b, r: (0, 0)),
                ],
                out_specs=pl.BlockSpec((1, row_tile, Dp), lambda b, r: (b, r, 0)),
            ),
            compiler_params=params,
        )(adj, t, bias_arr)

    t = hop(support, zero_bias, hop_dtype)
    t = hop(t, zero_bias, hop_dtype)
    return hop(t, b_p, out_dtype)


# ------------------------------- wrapper ------------------------------------


def graph_convolution(x, adj, weight, bias=None, *, out_dtype=None, force_path=None):
    """x: (B, N, D_in), adj: (B, N, N), weight: (D_in, D_out), bias: (D_out,) or None."""
    B, N, D_in = x.shape
    D_out = weight.shape[1]
    out_dtype = jnp.dtype(out_dtype) if out_dtype is not None else x.dtype

    # ---- lane-dense padding: feature dim and graph dim up to multiples of 128 ----
    Dp = _round_up(D_out, 128)
    Np = _round_up(N, 128)

    w_p = jnp.zeros((D_in, Dp), weight.dtype).at[:, :D_out].set(weight)
    b_p = jnp.zeros((1, Dp), jnp.float32)
    if bias is not None:
        b_p = b_p.at[0, :D_out].set(bias.astype(jnp.float32))

    if Np != N:
        # Zero rows/cols are exact for adj^3 propagation; padded outputs are sliced off.
        x = jnp.pad(x, ((0, 0), (0, Np - N), (0, 0)))
        adj = jnp.pad(adj, ((0, 0), (0, Np - N), (0, Np - N)))

    # ---- generation-aware VMEM budgeting ----
    vmem_cap = _vmem_capacity_bytes()
    vmem_limit = int(vmem_cap * 0.8)   # headroom for Mosaic internal scratch
    budget = (vmem_limit * 3) // 4     # headroom for what the estimate misses

    # Fused-path per-batch-element bytes: double-buffered blocks + f32 intermediates.
    per_batch = (
        2 * Np * Np * adj.dtype.itemsize
        + 2 * Np * D_in * x.dtype.itemsize
        + 2 * Np * Dp * out_dtype.itemsize
        + 2 * Np * Dp * 4
    )
    fixed = 2 * D_in * Dp * w_p.dtype.itemsize + 2 * Dp * 4
    bt_fit = (budget - fixed) // per_batch

    use_fused = bt_fit >= 1
    if force_path == "fused":
        use_fused = True
    elif force_path == "hop":
        use_fused = False

    if use_fused:
        out = _gcn_fused(x, adj, w_p, b_p, out_dtype, max(1, bt_fit), vmem_limit)
    else:
        out = _gcn_row_tiled(x, adj, w_p, b_p, out_dtype, budget, vmem_limit)

    return out[:, :N, :D_out]


def reference(x, adj, weight, bias):
    a3 = jnp.einsum("bij,bjk,bkl->bil", adj, adj, adj)
    support = jnp.einsum("bnd,de->bne", x, weight)
    out = jnp.einsum("bnm,bme->bne", a3, support)
    if bias is not None:
        out = out + bias
    return out


if __name__ == "__main__":
    B, N, D_in, D_out = 2, 16, 8, 16

    key = jax.random.PRNGKey(0)
    kx, ka, kw = jax.random.split(key, 3)

    x = jax.random.normal(kx, (B, N, D_in), dtype=jnp.float32)
    adj = jax.random.normal(ka, (B, N, N), dtype=jnp.float32)

    # Deterministic Xavier-normal weight, zero bias (matches reset_parameters()).
    std = (2.0 / (D_in + D_out)) ** 0.5
    weight = std * jax.random.normal(kw, (D_in, D_out), dtype=jnp.float32)
    bias = jnp.zeros((D_out,), dtype=jnp.float32)

    ref = reference(x, adj, weight, bias)

    # Fused (whole-graph) path.
    out_fused = graph_convolution(x, adj, weight, bias)
    jax.block_until_ready(out_fused)
    assert out_fused.shape == (B, N, D_out)
    assert jnp.allclose(out_fused, ref, atol=1e-3, rtol=1e-3)

    # Row-tiled (large-graph) path, exercised at small shapes for correctness.
    out_hop = graph_convolution(x, adj, weight, bias, force_path="hop")
    jax.block_until_ready(out_hop)
    assert out_hop.shape == (B, N, D_out)
    assert jnp.allclose(out_hop, ref, atol=1e-3, rtol=1e-3)

    print("KERNEL_OK")
</pallas_src>

<mosaic_0001>
module attributes {stable_mosaic.version = 11 : i64} {
  func.func @_gcn_fused_kernel(%arg0: i32, %arg1: memref<1x128x8xf32, #tpu.memory_space<vmem>>, %arg2: memref<1x128x128xf32, #tpu.memory_space<vmem>>, %arg3: memref<8x128xf32, #tpu.memory_space<vmem>>, %arg4: memref<1x128xf32, #tpu.memory_space<vmem>>, %arg5: memref<1x128x128xf32, #tpu.memory_space<vmem>>) attributes {dimension_semantics = [#tpu.dimension_semantics<parallel>], iteration_bounds = array<i64: 2>, scalar_prefetch = 0 : i64, scratch_operands = 0 : i64, tpu.core_type = #tpu.core_type<tc>, window_params = [{transform_indices = @transform_0, window_bounds = array<i64: 1, 128, 8>}, {transform_indices = @transform_1, window_bounds = array<i64: 1, 128, 128>}, {pipeline_mode = #tpu.pipeline_mode<synchronous>, transform_indices = @transform_2, window_bounds = array<i64: 8, 128>}, {pipeline_mode = #tpu.pipeline_mode<synchronous>, transform_indices = @transform_3, window_bounds = array<i64: 1, 128>}, {transform_indices = @transform_4, window_bounds = array<i64: 1, 128, 128>}]} {
    %c0 = arith.constant 0 : index
    %c0_0 = arith.constant 0 : index
    %c0_1 = arith.constant 0 : index
    %0 = vector.load %arg1[%c0, %c0_0, %c0_1] : memref<1x128x8xf32, #tpu.memory_space<vmem>>, vector<1x128x8xf32>
    %1 = vector.shape_cast %0 : vector<1x128x8xf32> to vector<128x8xf32>
    %c0_2 = arith.constant 0 : index
    %c0_3 = arith.constant 0 : index
    %2 = vector.load %arg3[%c0_2, %c0_3] : memref<8x128xf32, #tpu.memory_space<vmem>>, vector<8x128xf32>
    %cst = arith.constant dense<0.000000e+00> : vector<128x128xf32>
    %3 = tpu.matmul %1, %2, %cst {dimension_numbers = #tpu.dot_dimension_numbers<[1], [0], [0], [1], [0, 0, 1, 1], [], []>} : vector<128x8xf32>, vector<8x128xf32>, vector<128x128xf32> -> vector<128x128xf32>
    %4 = vector.shape_cast %3 : vector<128x128xf32> to vector<1x128x128xf32>
    %c0_4 = arith.constant 0 : index
    %c0_5 = arith.constant 0 : index
    %c0_6 = arith.constant 0 : index
    %5 = vector.load %arg2[%c0_4, %c0_5, %c0_6] : memref<1x128x128xf32, #tpu.memory_space<vmem>>, vector<1x128x128xf32>
    "tpu.trace_start"() <{level = 10 : i32, message = "bij,bjk->bik"}> : () -> ()
    %cst_7 = arith.constant dense<0.000000e+00> : vector<1x128x128xf32>
    %6 = tpu.matmul %5, %4, %cst_7 {dimension_numbers = #tpu.dot_dimension_numbers<[2], [1], [1], [2], [0, 0, 0, 1, 1, 2], [0], [0]>} : vector<1x128x128xf32>, vector<1x128x128xf32>, vector<1x128x128xf32> -> vector<1x128x128xf32>
    %cst_8 = arith.constant dense<0.000000e+00> : vector<1x128x128xf32>
    %7 = tpu.matmul %5, %6, %cst_8 {dimension_numbers = #tpu.dot_dimension_numbers<[2], [1], [1], [2], [0, 0, 0, 1, 1, 2], [0], [0]>} : vector<1x128x128xf32>, vector<1x128x128xf32>, vector<1x128x128xf32> -> vector<1x128x128xf32>
    %cst_9 = arith.constant dense<0.000000e+00> : vector<1x128x128xf32>
    %8 = tpu.matmul %5, %7, %cst_9 {dimension_numbers = #tpu.dot_dimension_numbers<[2], [1], [1], [2], [0, 0, 0, 1, 1, 2], [0], [0]>} : vector<1x128x128xf32>, vector<1x128x128xf32>, vector<1x128x128xf32> -> vector<1x128x128xf32>
    "tpu.trace_stop"() : () -> ()
    %c0_10 = arith.constant 0 : index
    %c0_11 = arith.constant 0 : index
    %9 = vector.load %arg4[%c0_10, %c0_11] : memref<1x128xf32, #tpu.memory_space<vmem>>, vector<1x128xf32>
    %10 = vector.shape_cast %9 : vector<1x128xf32> to vector<1x1x128xf32>
    %11 = vector.broadcast %10 : vector<1x1x128xf32> to vector<1x128x128xf32>
    %12 = arith.addf %8, %11 : vector<1x128x128xf32>
    %c0_12 = arith.constant 0 : index
    %c0_13 = arith.constant 0 : index
    %c0_14 = arith.constant 0 : index
    %13 = vector.load %arg5[%c0_12, %c0_13, %c0_14] : memref<1x128x128xf32, #tpu.memory_space<vmem>>, vector<1x128x128xf32>
    tpu.vector_store %arg5[%c0_12, %c0_13, %c0_14], %12 {strides = array<i32>} : memref<1x128x128xf32, #tpu.memory_space<vmem>>, vector<1x128x128xf32>,
    return
  }
  func.func @transform_0(%arg0: i32) -> (i32, i32, i32) {
    %c0_i32 = arith.constant 0 : i32
    %c0_i32_0 = arith.constant 0 : i32
    %c0_i32_1 = arith.constant 0 : i32
    return %arg0, %c0_i32, %c0_i32_0 : i32, i32, i32
  }
  func.func @transform_1(%arg0: i32) -> (i32, i32, i32) {
    %c0_i32 = arith.constant 0 : i32
    %c0_i32_0 = arith.constant 0 : i32
    %c0_i32_1 = arith.constant 0 : i32
    return %arg0, %c0_i32, %c0_i32_0 : i32, i32, i32
  }
  func.func @transform_2(%arg0: i32) -> (i32, i32) {
    %c0_i32 = arith.constant 0 : i32
    %c0_i32_0 = arith.constant 0 : i32
    %c0_i32_1 = arith.constant 0 : i32
    return %c0_i32, %c0_i32_0 : i32, i32
  }
  func.func @transform_3(%arg0: i32) -> (i32, i32) {
    %c0_i32 = arith.constant 0 : i32
    %c0_i32_0 = arith.constant 0 : i32
    %c0_i32_1 = arith.constant 0 : i32
    return %c0_i32, %c0_i32_0 : i32, i32
  }
  func.func @transform_4(%arg0: i32) -> (i32, i32, i32) {
    %c0_i32 = arith.constant 0 : i32
    %c0_i32_0 = arith.constant 0 : i32
    %c0_i32_1 = arith.constant 0 : i32
    return %arg0, %c0_i32, %c0_i32_0 : i32, i32, i32
  }
}

</mosaic_0001>

<bundles_post_ra>
// kernel: tpu_custom_call.1
= control target key start
LH: loop header
LB: loop body
LE: loop exit
PB: predicated region body
PF: predicated region fallthrough
CT: control target
= control target key end

     0   :  { %9 = vsyncpa [#allocation3], 0  ;;  %s1849_s0 = inlined_call_operand.vmem [shape: f32[2,128,8], index: 0, kind: input, shape index: {}]   ;;  %s1850_s1 = inlined_call_operand.vmem [shape: f32[2,128,128], index: 1, kind: input, shape index: {}]   ;;  %s1851_s2 = inlined_call_operand.vmem [shape: f32[8,128], index: 2, kind: input, shape index: {}]   ;;  %s1852_s3 = inlined_call_operand.vmem [shape: f32[1,128], index: 3, kind: input, shape index: {}]   ;;  %s1853_s4 = inlined_call_operand.hbm [shape: f32[2,128,128], index: 4, kind: output, shape index: {}]  }
   0x1   :  { %11 = vsyncpa [#allocation3 + $0x1], 0  ;;  %s1575_s15 = smov 0   ;;  %s1577_s16 = smov 0  }
   0x2   :  { %s1579_s17 = smov 0   ;;  %s1581_s18 = smov 0  }
   0x3 LB: > { %s1596_s19 = sadd.s32 4294967295, %s1545_s18   ;;  %s989_s20 = sadd.s32 4294967294, %s1545_s18   ;;  %s1545_s18 = sphi %s1581_s18, %s1859_s18   ;;  %s1541_s17 = sphi %s1579_s17, %s1858_s17   ;;  %s1537_s16 = sphi %s1577_s16, %s1857_s16   ;;  %s1533_s15 = sphi %s1575_s15, %s1856_s15  }
   0x4   : > { %s1600_s21 = sadd.s32 1, %s1545_s18   ;;  %s118_s22 = sadd.s32 1, %s1541_s17 }
   0x5   : > { %s115_s23 = ssub.s32 %s1545_s18, %s1600_s21  ;;  %p128_p0 = scmp.ne.s32.totalorder %s1541_s17, %s1537_s16 }
   0x6   : > { %p116_p1 = scmp.eq.s32.totalorder %s115_s23, 0  ;;  %p129_p2 = scmp.eq.s32.totalorder %s1596_s19, 1 }
   0x7   : > { %p134_p3 = scmp.ne.s32.totalorder %s1537_s16, %s1533_s15  ;;  %p135_p4 = scmp.eq.s32.totalorder %s989_s20, 1 }
   0x8   : > { %s1611_s24 = scalar_select %p116_p1, %s1541_s17, %s118_s22  }
   0x9   : > { %p1613_p5 = por %p129_p2, %p128_p0  ;;  %p1617_p6 = por %p135_p4, %p134_p3 }
   0xa   : > { %p992_p7 = scmp.ge.s32.totalorder %s1545_s18, 1  ;;  %p175_p8 = scmp.lt.s32.totalorder %s1545_s18, 3 }
   0xc   : > { %p176_p9 = pnand %p992_p7, %p175_p8 }
   0xd   : > { %v232_v0 = vld [vmem:[%s1851_s2] sm:$0xff] (!%p176_p9)  ;;  %p206_p10 = scmp.lt.s32.totalorder (!%p176_p9), %s1596_s19, 1  ;;  %vm233_vm0 = vcmask (!%p176_p9), 64512   ;;  %s203_s11 = sand.u32 (!%p176_p9), 1, %s1537_s16  }
   0xe   : > { %179 = sbr.rel (%p176_p9) target bundleno = 1014 (0x3f6), region = 36  ;;  %1136 = vmatprep.subr.mxu0 (!%p176_p9), %v232_v0  ;;  %s993_s12 = sshll.u32 (!%p176_p9), %s203_s11, 7 }
   0xf   : > { %1137 = vmatpush3.msra.mxu0 (!%p176_p9), %v232_v0  ;;  %s1779_s20 = scalar_lea.vmem (!%p176_p9), [#allocation2], %s993_s12  ;;  %s1022_s22 = sshll.u32 (!%p176_p9), %s1596_s19, 11 }
  0x10   : > { %s915_s23 = sshll.u32 (!%p176_p9), %s1779_s20, 4  ;;  %s1547_s5 = smov (!%p176_p9), [#allocation2]   ;;  %s1802_s23 = int_to_ptr.vmem [resolvable:$true] %s915_s23 }
  0x11   : > { %s1487_s6 = sshll.u32 (!%p176_p9), %s1547_s5, 4  ;;  %s1488_s6 = int_to_ptr.vmem [resolvable:$false] %s1487_s6 }
  0x12   : > { %p1490_p0 = scmp.lt.s32.totalorder (!%p176_p9), %s1802_s23, %s1488_s6 }
  0x15   : > { %s1628_s29 = scalar_select %p206_p10, %s1596_s19, 1 }
  0x16   : > { %s1808_s19 = scalar_lea.sflag [#allocation3], %s203_s11 }
  0x17   : > { %s1020_s30 = sshll.u32 %s1628_s29, 7  ;;  %s1800_s29 = scalar_lea.hbm %s1853_s4, %s1022_s22 }
  0x18   : > { %s1636_s7 = scalar_lea.vmem %s1849_s0, %s1020_s30  ;;  %s1675_s10 = scalar_lea.vmem %s1850_s1, %s1020_s30 }
  0x19   : > { %v216_v1 = vld [vmem:[%s1636_s7] sm:$0xff]  ;;  %v217_v2 = vld [vmem:[%s1636_s7 + $0x8] sm:$0xff]  ;;  %v218_v3 = vld [vmem:[%s1636_s7 + $0x10] sm:$0xff]  ;;  %s1483_s30 = scalar_lea.vmem %s1802_s23, 2048 }
  0x1a   : > { %1138 = vmatprep.mubr.msk.f32.mxu0 %vm233_vm0, %v216_v1  ;;  %v219_v4 = vld [vmem:[%s1636_s7 + $0x18] sm:$0xff]  ;;  %v220_v5 = vld [vmem:[%s1636_s7 + $0x20] sm:$0xff]  ;;  %v221_v6 = vld [vmem:[%s1636_s7 + $0x28] sm:$0xff]  ;;  %p1484_p11 = scmp.ne.s32.totalorder %s1802_s23, %s1483_s30 }
  0x1b   : > { %1139 = vmatmul.mubr.msk.f32.vlgmr.msra.gmra.mrb[0].mxu0 %vm233_vm0, %v217_v2  ;;  %v222_v7 = vld [vmem:[%s1636_s7 + $0x30] sm:$0xff]  ;;  %v223_v8 = vld [vmem:[%s1636_s7 + $0x38] sm:$0xff]  ;;  %v224_v9 = vld [vmem:[%s1636_s7 + $0x40] sm:$0xff] }
  0x1c   : > { %1141 = vmatprep.mubr.msk.f32.mxu0 %vm233_vm0, %v218_v3  ;;  %v225_v10 = vld [vmem:[%s1636_s7 + $0x48] sm:$0xff]  ;;  %v226_v11 = vld [vmem:[%s1636_s7 + $0x50] sm:$0xff]  ;;  %v227_v12 = vld [vmem:[%s1636_s7 + $0x58] sm:$0xff]  ;;  %p1485_p12 = pnand %p1484_p11, %p1613_p5 }
  0x1d   : > { %v228_v13 = vld [vmem:[%s1636_s7 + $0x60] sm:$0xff]  ;;  %v229_v14 = vld [vmem:[%s1636_s7 + $0x68] sm:$0xff]  ;;  %v230_v15 = vld [vmem:[%s1636_s7 + $0x70] sm:$0xff] }
  0x1e   : > { %v231_v16 = vld [vmem:[%s1636_s7 + $0x78] sm:$0xff]  ;;  %v1678_v17 = vld [vmem:[%s1675_s10] sm:$0xff]  ;;  %v1683_v42 = vld [vmem:[%s1675_s10 + $0x8] sm:$0xff]  ;;  %p1486_p13 = pneg %p1485_p12  ;;  %s1489_s7 = scalar_lea.vmem %s1488_s6, 4096 }
  0x1f   : > { %1142 = vmatmul.mubr.msk.f32.gmra.mrb[2].mxu0 %vm233_vm0, %v219_v4  ;;  %1194 = vmatprep.mubr.f32.mxu1 %v1678_v17  ;;  %v1686_v43 = vld [vmem:[%s1675_s10 + $0x10] sm:$0xff]  ;;  %v1691_v44 = vld [vmem:[%s1675_s10 + $0x18] sm:$0xff]  ;;  %v1694_v45 = vld [vmem:[%s1675_s10 + $0x20] sm:$0xff]  ;;  %p1491_p1 = scmp.lt.s32.totalorder %s1489_s7, %s1483_s30 }
  0x20   : > { %1144 = vmatprep.mubr.msk.f32.mxu0 %vm233_vm0, %v220_v5  ;;  %v1699_v46 = vld [vmem:[%s1675_s10 + $0x28] sm:$0xff]  ;;  %v1702_v47 = vld [vmem:[%s1675_s10 + $0x30] sm:$0xff]  ;;  %v1707_v48 = vld [vmem:[%s1675_s10 + $0x38] sm:$0xff] }
  0x21   : > { %v1710_v49 = vld [vmem:[%s1675_s10 + $0x40] sm:$0xff]  ;;  %v1715_v50 = vld [vmem:[%s1675_s10 + $0x48] sm:$0xff]  ;;  %v1718_v51 = vld [vmem:[%s1675_s10 + $0x50] sm:$0xff]  ;;  %p1492_p2 = por %p1491_p1, %p1490_p0 }
  0x22   : > { %v1723_v52 = vld [vmem:[%s1675_s10 + $0x58] sm:$0xff]  ;;  %v1726_v53 = vld [vmem:[%s1675_s10 + $0x60] sm:$0xff]  ;;  %v1731_v54 = vld [vmem:[%s1675_s10 + $0x68] sm:$0xff] }
  0x23   : > { %1145 = vmatmul.mubr.msk.f32.gmra.mrb[4].mxu0 %vm233_vm0, %v221_v6  ;;  %v1734_v55 = vld [vmem:[%s1675_s10 + $0x70] sm:$0xff]  ;;  %v1739_v56 = vld [vmem:[%s1675_s10 + $0x78] sm:$0xff]  ;;  %p1493_p3 = pnand %p1492_p2, %p1486_p13 }
  0x24   : > { %1147 = vmatprep.mubr.msk.f32.mxu0 %vm233_vm0, %v222_v7 }
  0x27   : > { %1148 = vmatmul.mubr.msk.f32.gmra.mrb[6].mxu0 %vm233_vm0, %v223_v8 }
  0x28   : > { %1150 = vmatprep.mubr.msk.f32.mxu0 %vm233_vm0, %v224_v9 }
  0x2b   : > { %1151 = vmatmul.mubr.msk.f32.gmra.mrb[8].mxu0 %vm233_vm0, %v225_v10 }
  0x2c   : > { %1153 = vmatprep.mubr.msk.f32.mxu0 %vm233_vm0, %v226_v11 }
  0x2f   : > { %1154 = vmatmul.mubr.msk.f32.gmra.mrb[10].mxu0 %vm233_vm0, %v227_v12 }
  0x30   : > { %1156 = vmatprep.mubr.msk.f32.mxu0 %vm233_vm0, %v228_v13 }
  0x33   : > { %1157 = vmatmul.mubr.msk.f32.gmra.mrb[12].mxu0 %vm233_vm0, %v229_v14 }
  0x34   : > { %1159 = vmatprep.mubr.msk.f32.mxu0 %vm233_vm0, %v230_v15 }
  0x37   : > { %1160 = vmatmul.mubr.msk.f32.gmra.mrb[14].mxu0 %vm233_vm0, %v231_v16 }
  0x38   : > { %1250 = vmatprep.mubr.f32.mxu0 %v1678_v17 }
  0xee   : > { %v1140_v18 = vpop.f32.mrb[0].mxu0 }
  0xef   : > { %v348_v19 = vpop.f32.mrb[1].mxu0 }
  0xf0   : > { %v1330_v20 = vpack.c.bf16 %v1140_v18, %v348_v19 }
  0xf2   : > { %v1143_v21 = vpop.f32.mrb[2].mxu0  ;;  %1331 = vmatprep.subr.bf16.mxu1 %v1330_v20 }
  0xf3   : > { %v358_v22 = vpop.f32.mrb[3].mxu0  ;;  %1333 = vmatpush3.bf16.msra.mxu1 %v1330_v20 }
  0xf4   : > { %v1334_v23 = vpack.c.bf16 %v1143_v21, %v358_v22 }
  0xf6   : > { %v1146_v24 = vpop.f32.mrb[4].mxu0  ;;  %1335 = vmatprep.subr.bf16.mxu1 %v1334_v23 }
  0xf7   : > { %v368_v25 = vpop.f32.mrb[5].mxu0  ;;  %1337 = vmatpush3.bf16.msra.mxu1 %v1334_v23 }
  0xf8   : > { %v1338_v26 = vpack.c.bf16 %v1146_v24, %v368_v25 }
  0xfa   : > { %v1149_v27 = vpop.f32.mrb[6].mxu0  ;;  %1339 = vmatprep.subr.bf16.mxu1 %v1338_v26 }
  0xfb   : > { %v378_v28 = vpop.f32.mrb[7].mxu0  ;;  %1341 = vmatpush3.bf16.msra.mxu1 %v1338_v26 }
  0xfc   : > { %v1342_v29 = vpack.c.bf16 %v1149_v27, %v378_v28 }
  0xfe   : > { %v1152_v30 = vpop.f32.mrb[8].mxu0  ;;  %1343 = vmatprep.subr.bf16.mxu1 %v1342_v29 }
  0xff   : > { %v388_v31 = vpop.f32.mrb[9].mxu0  ;;  %1345 = vmatpush3.bf16.msra.mxu1 %v1342_v29 }
 0x100   : > { %v1346_v32 = vpack.c.bf16 %v1152_v30, %v388_v31 }
 0x102   : > { %v1155_v33 = vpop.f32.mrb[10].mxu0  ;;  %1347 = vmatprep.subr.bf16.mxu1 %v1346_v32 }
 0x103   : > { %v398_v34 = vpop.f32.mrb[11].mxu0  ;;  %1349 = vmatpush3.bf16.msra.mxu1 %v1346_v32 }
 0x104   : > { %v1350_v35 = vpack.c.bf16 %v1155_v33, %v398_v34 }
 0x106   : > { %v1158_v36 = vpop.f32.mrb[12].mxu0  ;;  %1351 = vmatprep.subr.bf16.mxu1 %v1350_v35 }
 0x107   : > { %v408_v37 = vpop.f32.mrb[13].mxu0  ;;  %1353 = vmatpush3.bf16.msra.mxu1 %v1350_v35 }
 0x108   : > { %v1354_v38 = vpack.c.bf16 %v1158_v36, %v408_v37 }
 0x10a   : > { %v1161_v39 = vpop.f32.mrb[14].mxu0  ;;  %1355 = vmatprep.subr.bf16.mxu1 %v1354_v38 }
 0x10b   : > { %v418_v40 = vpop.f32.mrb[15].mxu0  ;;  %1357 = vmatpush3.bf16.msra.mxu1 %v1354_v38 }
 0x10c   : > { %v1358_v41 = vpack.c.bf16 %v1161_v39, %v418_v40 }
 0x10e   : > { %1359 = vmatprep.subr.bf16.mxu1 %v1358_v41 }
 0x10f   : > { %1361 = vmatpush3.bf16.msra.mxu1 %v1358_v41  ;;  %v1014_v41 = vld [vmem:[%s1852_s3] ss:$0 sm:$0xff] }
 0x112   : > { %1195 = vmatmul.mubr.f32.vlgmr.msra.gmra.mrb[0].mxu1 %v1683_v42 }
 0x113   : > { %1197 = vmatprep.mubr.f32.mxu1 %v1686_v43 }
 0x116   : > { %1198 = vmatmul.mubr.f32.gmra.mrb[2].mxu1 %v1691_v44 }
 0x117   : > { %1200 = vmatprep.mubr.f32.mxu1 %v1694_v45 }
 0x11a   : > { %1201 = vmatmul.mubr.f32.gmra.mrb[4].mxu1 %v1699_v46 }
 0x11b   : > { %1203 = vmatprep.mubr.f32.mxu1 %v1702_v47 }
 0x11e   : > { %1204 = vmatmul.mubr.f32.gmra.mrb[6].mxu1 %v1707_v48 }
 0x11f   : > { %1206 = vmatprep.mubr.f32.mxu1 %v1710_v49 }
 0x122   : > { %1207 = vmatmul.mubr.f32.gmra.mrb[8].mxu1 %v1715_v50 }
 0x123   : > { %1209 = vmatprep.mubr.f32.mxu1 %v1718_v51 }
 0x126   : > { %1210 = vmatmul.mubr.f32.gmra.mrb[10].mxu1 %v1723_v52 }
 0x127   : > { %1212 = vmatprep.mubr.f32.mxu1 %v1726_v53 }
 0x12a   : > { %1213 = vmatmul.mubr.f32.gmra.mrb[12].mxu1 %v1731_v54 }
 0x12b   : > { %1215 = vmatprep.mubr.f32.mxu1 %v1734_v55 }
 0x12e   : > { %1216 = vmatmul.mubr.f32.gmra.mrb[14].mxu1 %v1739_v56 }
 0x12f   : > { %1315 = vmatprep.mubr.f32.mxu1 %v1702_v47 }
 0x1e5   : > { %v1196_v57 = vpop.f32.mrb[0].mxu1 }
 0x1e6   : > { %v509_v58 = vpop.f32.mrb[1].mxu1 }
 0x1e7   : > { %v1362_v59 = vpack.c.bf16 %v1196_v57, %v509_v58 }
 0x1e9   : > { %v1199_v60 = vpop.f32.mrb[2].mxu1  ;;  %1363 = vmatprep.subr.bf16.mxu0 %v1362_v59 }
 0x1ea   : > { %v519_v61 = vpop.f32.mrb[3].mxu1  ;;  %1365 = vmatpush3.bf16.msra.mxu0 %v1362_v59 }
 0x1eb   : > { %v1366_v62 = vpack.c.bf16 %v1199_v60, %v519_v61 }
 0x1ed   : > { %v1202_v63 = vpop.f32.mrb[4].mxu1  ;;  %1367 = vmatprep.subr.bf16.mxu0 %v1366_v62 }
 0x1ee   : > { %v529_v0 = vpop.f32.mrb[5].mxu1  ;;  %1369 = vmatpush3.bf16.msra.mxu0 %v1366_v62 }
 0x1ef   : > { %v1370_v1 = vpack.c.bf16 %v1202_v63, %v529_v0 }
 0x1f1   : > { %v1205_v2 = vpop.f32.mrb[6].mxu1  ;;  %1371 = vmatprep.subr.bf16.mxu0 %v1370_v1 }
 0x1f2   : > { %v539_v3 = vpop.f32.mrb[7].mxu1  ;;  %1373 = vmatpush3.bf16.msra.mxu0 %v1370_v1 }
 0x1f3   : > { %v1374_v4 = vpack.c.bf16 %v1205_v2, %v539_v3 }
 0x1f5   : > { %v1208_v5 = vpop.f32.mrb[8].mxu1  ;;  %1375 = vmatprep.subr.bf16.mxu0 %v1374_v4 }
 0x1f6   : > { %v549_v6 = vpop.f32.mrb[9].mxu1  ;;  %1377 = vmatpush3.bf16.msra.mxu0 %v1374_v4 }
 0x1f7   : > { %v1378_v7 = vpack.c.bf16 %v1208_v5, %v549_v6 }
 0x1f9   : > { %v1211_v8 = vpop.f32.mrb[10].mxu1  ;;  %1379 = vmatprep.subr.bf16.mxu0 %v1378_v7 }
 0x1fa   : > { %v559_v9 = vpop.f32.mrb[11].mxu1  ;;  %1381 = vmatpush3.bf16.msra.mxu0 %v1378_v7 }
 0x1fb   : > { %v1382_v10 = vpack.c.bf16 %v1211_v8, %v559_v9 }
 0x1fd   : > { %v1214_v11 = vpop.f32.mrb[12].mxu1  ;;  %1383 = vmatprep.subr.bf16.mxu0 %v1382_v10 }
 0x1fe   : > { %v569_v12 = vpop.f32.mrb[13].mxu1  ;;  %1385 = vmatpush3.bf16.msra.mxu0 %v1382_v10 }
 0x1ff   : > { %v1386_v13 = vpack.c.bf16 %v1214_v11, %v569_v12 }
 0x201   : > { %v1217_v14 = vpop.f32.mrb[14].mxu1  ;;  %1387 = vmatprep.subr.bf16.mxu0 %v1386_v13 }
 0x202   : > { %v579_v15 = vpop.f32.mrb[15].mxu1  ;;  %1389 = vmatpush3.bf16.msra.mxu0 %v1386_v13 }
 0x203   : > { %v1390_v16 = vpack.c.bf16 %v1217_v14, %v579_v15 }
 0x205   : > { %1391 = vmatprep.subr.bf16.mxu0 %v1390_v16 }
 0x206   : > { %1393 = vmatpush3.bf16.msra.mxu0 %v1390_v16 }
 0x209   : > { %1251 = vmatmul.mubr.f32.vlgmr.msra.gmra.mrb[16].mxu0 %v1683_v42 }
 0x20a   : > { %1253 = vmatprep.mubr.f32.mxu0 %v1686_v43 }
 0x20d   : > { %1254 = vmatmul.mubr.f32.gmra.mrb[18].mxu0 %v1691_v44 }
 0x20e   : > { %1256 = vmatprep.mubr.f32.mxu0 %v1694_v45 }
 0x211   : > { %1257 = vmatmul.mubr.f32.gmra.mrb[20].mxu0 %v1699_v46 }
 0x212   : > { %1259 = vmatprep.mubr.f32.mxu0 %v1702_v47 }
 0x215   : > { %1260 = vmatmul.mubr.f32.gmra.mrb[22].mxu0 %v1707_v48 }
 0x216   : > { %1262 = vmatprep.mubr.f32.mxu0 %v1710_v49 }
 0x219   : > { %1263 = vmatmul.mubr.f32.gmra.mrb[24].mxu0 %v1715_v50 }
 0x21a   : > { %1265 = vmatprep.mubr.f32.mxu0 %v1718_v51 }
 0x21d   : > { %1266 = vmatmul.mubr.f32.gmra.mrb[26].mxu0 %v1723_v52 }
 0x21e   : > { %1268 = vmatprep.mubr.f32.mxu0 %v1726_v53 }
 0x221   : > { %1269 = vmatmul.mubr.f32.gmra.mrb[28].mxu0 %v1731_v54 }
 0x222   : > { %1271 = vmatprep.mubr.f32.mxu0 %v1734_v55 }
 0x225   : > { %1272 = vmatmul.mubr.f32.gmra.mrb[30].mxu0 %v1739_v56 }
 0x226   : > { %1306 = vmatprep.mubr.f32.mxu0 %v1678_v17 }
 0x2dc   : > { %v1252_v18 = vpop.f32.mrb[16].mxu0 }
 0x2dd   : > { %v654_v19 = vpop.f32.mrb[17].mxu0 }
 0x2de   : > { %v1394_v20 = vpack.c.bf16 %v1252_v18, %v654_v19 }
 0x2e0   : > { %v1255_v21 = vpop.f32.mrb[18].mxu0  ;;  %1395 = vmatprep.subr.bf16.mxu0 %v1394_v20  ;;  %1426 = vmatprep.subr.bf16.mxu1 %v1394_v20 }
 0x2e1   : > { %v664_v22 = vpop.f32.mrb[19].mxu0  ;;  %1397 = vmatpush3.bf16.msra.mxu0 %v1394_v20  ;;  %1434 = vmatpush3.bf16.msra.mxu1 %v1394_v20 }
 0x2e2   : > { %v1398_v23 = vpack.c.bf16 %v1255_v21, %v664_v22 }
 0x2e4   : > { %v1258_v24 = vpop.f32.mrb[20].mxu0  ;;  %1399 = vmatprep.subr.bf16.mxu0 %v1398_v23  ;;  %1427 = vmatprep.subr.bf16.mxu1 %v1398_v23 }
 0x2e5   : > { %v674_v25 = vpop.f32.mrb[21].mxu0  ;;  %1401 = vmatpush3.bf16.msra.mxu0 %v1398_v23  ;;  %1435 = vmatpush3.bf16.msra.mxu1 %v1398_v23 }
 0x2e6   : > { %v1402_v26 = vpack.c.bf16 %v1258_v24, %v674_v25 }
 0x2e8   : > { %v1261_v27 = vpop.f32.mrb[22].mxu0  ;;  %1403 = vmatprep.subr.bf16.mxu0 %v1402_v26  ;;  %1428 = vmatprep.subr.bf16.mxu1 %v1402_v26 }
 0x2e9   : > { %v684_v17 = vpop.f32.mrb[23].mxu0  ;;  %1405 = vmatpush3.bf16.msra.mxu0 %v1402_v26  ;;  %1436 = vmatpush3.bf16.msra.mxu1 %v1402_v26 }
 0x2ea   : > { %v1406_v28 = vpack.c.bf16 %v1261_v27, %v684_v17 }
 0x2ec   : > { %v1264_v29 = vpop.f32.mrb[24].mxu0  ;;  %1407 = vmatprep.subr.bf16.mxu0 %v1406_v28  ;;  %1429 = vmatprep.subr.bf16.mxu1 %v1406_v28 }
 0x2ed   : > { %v694_v30 = vpop.f32.mrb[25].mxu0  ;;  %1409 = vmatpush3.bf16.msra.mxu0 %v1406_v28  ;;  %1437 = vmatpush3.bf16.msra.mxu1 %v1406_v28 }
 0x2ee   : > { %v1410_v31 = vpack.c.bf16 %v1264_v29, %v694_v30 }
 0x2f0   : > { %v1267_v32 = vpop.f32.mrb[26].mxu0  ;;  %1411 = vmatprep.subr.bf16.mxu0 %v1410_v31  ;;  %1430 = vmatprep.subr.bf16.mxu1 %v1410_v31 }
 0x2f1   : > { %v704_v33 = vpop.f32.mrb[27].mxu0  ;;  %1413 = vmatpush3.bf16.msra.mxu0 %v1410_v31  ;;  %1438 = vmatpush3.bf16.msra.mxu1 %v1410_v31 }
 0x2f2   : > { %v1414_v34 = vpack.c.bf16 %v1267_v32, %v704_v33 }
 0x2f4   : > { %v1270_v35 = vpop.f32.mrb[28].mxu0  ;;  %1415 = vmatprep.subr.bf16.mxu0 %v1414_v34  ;;  %1431 = vmatprep.subr.bf16.mxu1 %v1414_v34 }
 0x2f5   : > { %v714_v36 = vpop.f32.mrb[29].mxu0  ;;  %1417 = vmatpush3.bf16.msra.mxu0 %v1414_v34  ;;  %1439 = vmatpush3.bf16.msra.mxu1 %v1414_v34 }
 0x2f6   : > { %v1418_v37 = vpack.c.bf16 %v1270_v35, %v714_v36 }
 0x2f8   : > { %v1273_v38 = vpop.f32.mrb[30].mxu0  ;;  %1419 = vmatprep.subr.bf16.mxu0 %v1418_v37  ;;  %1432 = vmatprep.subr.bf16.mxu1 %v1418_v37 }
 0x2f9   : > { %v724_v39 = vpop.f32.mrb[31].mxu0  ;;  %1421 = vmatpush3.bf16.msra.mxu0 %v1418_v37  ;;  %1440 = vmatpush3.bf16.msra.mxu1 %v1418_v37 }
 0x2fa   : > { %v1422_v40 = vpack.c.bf16 %v1273_v38, %v724_v39 }
 0x2fc   : > { %1423 = vmatprep.subr.bf16.mxu0 %v1422_v40  ;;  %1433 = vmatprep.subr.bf16.mxu1 %v1422_v40 }
 0x2fd   : > { %1425 = vmatpush3.bf16.msra.mxu0 %v1422_v40  ;;  %1441 = vmatpush3.bf16.msra.mxu1 %v1422_v40 }
 0x300   : > { %1316 = vmatmul.mubr.f32.vlgmr.msra.gmra.mrb[16].mxu1 %v1707_v48  ;;  %1307 = vmatmul.mubr.f32.vlgmr.msra.gmra.mrb[32].mxu0 %v1683_v42 }
 0x301   : > { %1318 = vmatprep.mubr.f32.mxu1 %v1710_v49  ;;  %1309 = vmatprep.mubr.f32.mxu0 %v1686_v43 }
 0x304   : > { %1319 = vmatmul.mubr.f32.gmra.mrb[18].mxu1 %v1715_v50  ;;  %1310 = vmatmul.mubr.f32.gmra.mrb[34].mxu0 %v1691_v44 }
 0x305   : > { %1321 = vmatprep.mubr.f32.mxu1 %v1718_v51  ;;  %1312 = vmatprep.mubr.f32.mxu0 %v1694_v45 }
 0x308   : > { %1322 = vmatmul.mubr.f32.gmra.mrb[20].mxu1 %v1723_v52  ;;  %1313 = vmatmul.mubr.f32.gmra.mrb[36].mxu0 %v1699_v46 }
 0x309   : > { %1324 = vmatprep.mubr.f32.mxu1 %v1726_v53 }
 0x30c   : > { %1325 = vmatmul.mubr.f32.gmra.mrb[22].mxu1 %v1731_v54 }
 0x30d   : > { %1327 = vmatprep.mubr.f32.mxu1 %v1734_v55 }
 0x310   : > { %1328 = vmatmul.mubr.f32.gmra.mrb[24].mxu1 %v1739_v56 }
 0x3d3   : > { %v1317_v42 = vpop.f32.mrb[16].mxu1  ;;  %v1308_v43 = vpop.f32.mrb[32].mxu0 }
 0x3d4   : > { %v842_v44 = vadd.f32 %v1317_v42, %v1014_v41  ;;  %v836_v45 = vpop.f32.mrb[17].mxu1  ;;  %v812_v46 = vadd.f32 %v1308_v43, %v1014_v41  ;;  %v806_v47 = vpop.f32.mrb[33].mxu0 }
 0x3d5   : > { %v837_v48 = vadd.f32 %v1014_v41, %v836_v45  ;;  %v807_v49 = vadd.f32 %v1014_v41, %v806_v47 }
 0x3d6   : > { %892 = vst [vmem:[%s1779_s20 + $0x38] sm:$0xff] %v842_v44  ;;  %886 = vst [vmem:[%s1779_s20 + $0x8] sm:$0xff] %v812_v46 }
 0x3d7   : > { %891 = vst [vmem:[%s1779_s20 + $0x30] sm:$0xff] %v837_v48  ;;  %v1320_v50 = vpop.f32.mrb[18].mxu1  ;;  %885 = vst [vmem:[%s1779_s20] sm:$0xff] %v807_v49  ;;  %v1311_v51 = vpop.f32.mrb[34].mxu0 }
 0x3d8   : > { %v852_v52 = vadd.f32 %v1320_v50, %v1014_v41  ;;  %v846_v53 = vpop.f32.mrb[19].mxu1  ;;  %v822_v54 = vadd.f32 %v1311_v51, %v1014_v41  ;;  %v816_v55 = vpop.f32.mrb[35].mxu0 }
 0x3d9   : > { %v847_v56 = vadd.f32 %v1014_v41, %v846_v53  ;;  %v817_v57 = vadd.f32 %v1014_v41, %v816_v55 }
 0x3da   : > { %894 = vst [vmem:[%s1779_s20 + $0x48] sm:$0xff] %v852_v52  ;;  %888 = vst [vmem:[%s1779_s20 + $0x18] sm:$0xff] %v822_v54 }
 0x3db   : > { %893 = vst [vmem:[%s1779_s20 + $0x40] sm:$0xff] %v847_v56  ;;  %v1323_v58 = vpop.f32.mrb[20].mxu1  ;;  %887 = vst [vmem:[%s1779_s20 + $0x10] sm:$0xff] %v817_v57  ;;  %v1314_v59 = vpop.f32.mrb[36].mxu0 }
 0x3dc   : > { %v862_v60 = vadd.f32 %v1323_v58, %v1014_v41  ;;  %v856_v61 = vpop.f32.mrb[21].mxu1  ;;  %v832_v62 = vadd.f32 %v1314_v59, %v1014_v41  ;;  %v826_v63 = vpop.f32.mrb[37].mxu0 }
 0x3dd   : > { %v857_v0 = vadd.f32 %v1014_v41, %v856_v61  ;;  %v827_v1 = vadd.f32 %v1014_v41, %v826_v63 }
 0x3de   : > { %896 = vst [vmem:[%s1779_s20 + $0x58] sm:$0xff] %v862_v60  ;;  %890 = vst [vmem:[%s1779_s20 + $0x28] sm:$0xff] %v832_v62 }
 0x3df   : > { %895 = vst [vmem:[%s1779_s20 + $0x50] sm:$0xff] %v857_v0  ;;  %v1326_v2 = vpop.f32.mrb[22].mxu1  ;;  %889 = vst [vmem:[%s1779_s20 + $0x20] sm:$0xff] %v827_v1 }
 0x3e0   : > { %v872_v3 = vadd.f32 %v1326_v2, %v1014_v41  ;;  %v866_v4 = vpop.f32.mrb[23].mxu1 }
 0x3e1   : > { %v867_v5 = vadd.f32 %v1014_v41, %v866_v4 }
 0x3e2   : > { %898 = vst [vmem:[%s1779_s20 + $0x68] sm:$0xff] %v872_v3 }
 0x3e3   : > { %897 = vst [vmem:[%s1779_s20 + $0x60] sm:$0xff] %v867_v5  ;;  %v1329_v6 = vpop.f32.mrb[24].mxu1 }
 0x3e4   : > { %v882_v7 = vadd.f32 %v1329_v6, %v1014_v41  ;;  %v876_v8 = vpop.f32.mrb[25].mxu1 }
 0x3e5   : > { %v877_v9 = vadd.f32 %v1014_v41, %v876_v8 }
 0x3e6   : > { %900 = vst [vmem:[%s1779_s20 + $0x78] sm:$0xff] %v882_v7 }
 0x3e7   : > { %899 = vst [vmem:[%s1779_s20 + $0x70] sm:$0xff] %v877_v9 }
 0x3e8   : > { %1496 = shalt.err (!%p1493_p3)
}
 0x3e9   : > { %s1497_s8 = scalar_lea.hbm %s1800_s29, 2048  ;;  %s1501_s11 = scalar_lea.hbm %s1853_s4, 4096 }
 0x3ea   : > { %p1498_p4 = scmp.ne.s32.totalorder %s1800_s29, %s1497_s8  ;;  %p1502_p9 = scmp.lt.u32.totalorder %s1800_s29, %s1853_s4 }
 0x3eb   : > { %p1503_p10 = scmp.lt.u32.totalorder %s1501_s11, %s1497_s8  ;;  %p1505_p12 = scmp.lt.u32.totalorder %s1497_s8, %s1800_s29 }
 0x3ec   : > { %p1499_p7 = pnand %p1498_p4, %p1613_p5 }
 0x3ed   : > { %p1504_p11 = por %p1503_p10, %p1502_p9 }
 0x3ee   : > { %p1500_p8 = pneg %p1499_p7 }
 0x3ef   : > { %p1506_p13 = por %p1505_p12, %p1504_p11 }
 0x3f1   : > { %p1507_p0 = pnand %p1506_p13, %p1500_p8 }
 0x3f3   : > { %1510 = shalt.err (!%p1507_p0)
}
 0x3f4   : > { %s1548_s14 = smov 128   ;;  %s1549_s20 = smov 8  }
 0x3f5   : > { %1442 = dma.vmem_to_hbm [thread:$0]  (%p1613_p5), %s1802_s23, 2048, %s1800_s29, %s1808_s19, %s1548_s14, %s1548_s14, %s1549_s20  }
 0x3f6 PF: > { %p1448_p1 = scmp.ge.s32.totalorder %s1545_s18, 2  ;;  %s930_s22 = sand.u32 1, %s1533_s15  }
 0x3f7   : > { %s931_s27 = scalar_lea.sflag [#allocation3], %s930_s22 }
 0x3f8   : > { %p1445_p2 = pnand %p1448_p1, %p1617_p6 }
 0x3fa   : > { %1528 = dma.done.wait (!%p1445_p2), %s931_s27, 2048  }
 0x3fb   : > { %1530 = vsyncadd (!%p1445_p2), %s931_s27, 4294965248  ;;  %p14_p3 = scmp.ge.s32.totalorder %s1600_s21, 4   ;;  %s1856_s15 = smov %s1537_s16 }
 0x3fc   : > { %s1857_s16 = smov %s1541_s17  ;;  %s1858_s17 = smov %s1611_s24 }
 0x3fd   : > { %s1859_s18 = smov %s1600_s21  ;;  %16 = sbr.rel (!%p14_p3) target bundleno = 3 (0x3), region = 74 }
 0x404   :  { %936 = vsyncpa [#allocation3], 1 }
 0x405   :  { %938 = vsyncpa [#allocation3 + $0x1], 1 }

</bundles_post_ra>
